<compile_context>
chip_gen: v5e
topology: v5e:2x2
jax: 0.10.0
libtpu: 0.0.40
codegen_flags: <defaults>
</compile_context>

<pallas_src>
import jax
import jax.numpy as jnp
from jax.experimental import pallas as pl
from jax.experimental.pallas import tpu as pltpu


def _round_up(n, m):
    return ((n + m - 1) // m) * m


def netr_kernel(xt_ref, yt_ref, wht_ref, bh_ref, w1_ref, w2_ref, b1_ref, out_ref):
    # modelh (transposed): (H, in_f) @ (in_f, TB) -> (H, TB); batch on lanes.
    hxt = jnp.dot(wht_ref[...], xt_ref[...], preferred_element_type=jnp.float32)
    hxt = jnp.maximum(hxt + bh_ref[...], 0.0)           # (H,1) bias lane-bcast + ReLU

    # linear1 folded with W3[0]: (1, H) @ (H, TB) -> (1, TB) on the idle MXU.
    hx1 = jnp.dot(w1_ref[...], hxt, preferred_element_type=jnp.float32)
    # linear2 folded with W3[1]: (1, C) @ (C, TB) -> (1, TB), no bias.
    y1 = jnp.dot(w2_ref[...], yt_ref[...], preferred_element_type=jnp.float32)

    # folded bias (b1 * W3[0]) read as a scalar from SMEM.
    v = hx1 + y1 + b1_ref[0]

    # sigmoid = exp + approximate reciprocal; both land on the EUP slot and the
    # (1, TB) operand is lane-dense (TB/128 vregs instead of TB/8).
    out_ref[...] = pl.reciprocal(1.0 + jnp.exp(-v), approx=True)


def netr_forward(x, y, params, *, block_b=8192):
    wh, bh, w1, b1, w2, w3 = params
    B, in_f = x.shape
    C = y.shape[1]
    H = wh.shape[1]

    # ---- host-side folds / layout plumbing (weights: done once; x^T: one pass) ----
    wht = wh.T.astype(jnp.bfloat16)                                  # (H, in_f)
    bh_col = bh.reshape(H, 1).astype(jnp.float32)                    # (H, 1)
    w1c = (w1[:, 0] * w3[0, 0]).reshape(1, H).astype(jnp.float32)    # (1, H)
    w2c = (w2[:, 0] * w3[0, 1]).reshape(1, C).astype(jnp.float32)    # (1, C)
    b1c = (b1.reshape(-1)[:1] * w3[0, 0]).astype(jnp.float32)        # (1,) scalar

    xt = x.astype(jnp.bfloat16).T                                    # (in_f, B)
    yt = y.astype(jnp.float32).T                                     # (C, B)

    # ---- batch tiling: batch is the lane axis, so tiles are multiples of 128 ----
    # per-column pipeline bytes: double-buffered inputs/output + hx temp.
    per_col = 2 * (in_f * 2 + C * 4 + 4) + H * 4
    cap = max(128, ((4 << 20) // max(per_col, 1)) // 128 * 128)
    tb_max = max(128, min(block_b, cap))
    n_blocks = -(-B // tb_max)                       # ceil
    tb = _round_up(-(-B // n_blocks), 128)           # balance blocks, <2% padding
    b_pad = n_blocks * tb
    if b_pad != B:
        xt = jnp.pad(xt, ((0, 0), (0, b_pad - B)))
        yt = jnp.pad(yt, ((0, 0), (0, b_pad - B)))

    out = pl.pallas_call(
        netr_kernel,
        out_shape=jax.ShapeDtypeStruct((1, b_pad), jnp.float32),
        grid=(n_blocks,),
        in_specs=[
            pl.BlockSpec((in_f, tb), lambda i: (0, i)),          # x^T: batch-tiled
            pl.BlockSpec((C, tb), lambda i: (0, i)),             # y^T: batch-tiled
            pl.BlockSpec((H, in_f), lambda i: (0, 0)),           # Wh^T: VMEM resident
            pl.BlockSpec((H, 1), lambda i: (0, 0)),              # bh column
            pl.BlockSpec((1, H), lambda i: (0, 0)),              # w1*W3[0] row
            pl.BlockSpec((1, C), lambda i: (0, 0)),              # w2*W3[1] row
            pl.BlockSpec(memory_space=pltpu.MemorySpace.SMEM),   # b1*W3[0] scalar
        ],
        out_specs=pl.BlockSpec((1, tb), lambda i: (0, i)),       # lane-dense output
        compiler_params=pltpu.CompilerParams(
            dimension_semantics=("parallel",)),
    )(xt, yt, wht, bh_col, w1c, w2c, b1c)

    return out[0, :B].reshape(B, 1)


def init_params(key, in_features, h_out_features, num_classes):
    ks = jax.random.split(key, 6)
    # stored pre-transposed: [in, out]
    wh = jax.random.normal(ks[0], (in_features, h_out_features), jnp.float32) * 0.1
    bh = jax.random.normal(ks[1], (1, h_out_features), jnp.float32) * 0.1
    w1 = jax.random.normal(ks[2], (h_out_features, 1), jnp.float32) * 0.1
    b1 = jax.random.normal(ks[3], (1, 1), jnp.float32) * 0.1
    w2 = jax.random.normal(ks[4], (num_classes, 1), jnp.float32) * 0.1
    w3 = jax.random.normal(ks[5], (1, 2), jnp.float32) * 0.1
    return wh, bh, w1, b1, w2, w3


def netr_reference(x, y, params):
    wh, bh, w1, b1, w2, w3 = params
    hx = jnp.maximum(x @ wh + bh, 0.0)
    hx1 = hx @ w1 + b1
    y1 = y @ w2
    v = jnp.concatenate([hx1, y1], axis=1) @ w3.reshape(2, 1)
    return jax.nn.sigmoid(v)


if __name__ == "__main__":
    B = 8                 # batch
    in_features = 32      # input dim for modelh
    h_out_features = 32   # modelh output dim
    num_classes = 4       # label dim for y

    key = jax.random.PRNGKey(0)
    kx, ky, kp = jax.random.split(key, 3)
    x = jax.random.normal(kx, (B, in_features), jnp.float32)
    y = jax.random.normal(ky, (B, num_classes), jnp.float32)
    params = init_params(kp, in_features, h_out_features, num_classes)

    out = jax.block_until_ready(netr_forward(x, y, params))
    ref = netr_reference(x, y, params)

    assert out.shape == (B, 1)
    # bf16 MXU inputs (f32 accumulation) + approximate-reciprocal sigmoid:
    # compare against the pure-f32 reference with a relaxed tolerance.
    max_err = float(jnp.max(jnp.abs(out - ref)))
    assert jnp.allclose(out, ref, atol=2e-2, rtol=0.0), max_err

    print("KERNEL_OK")
</pallas_src>

<mosaic_0001>
module attributes {stable_mosaic.version = 11 : i64} {
  func.func @netr_kernel(%arg0: i32, %arg1: memref<32x128xbf16, #tpu.memory_space<vmem>>, %arg2: memref<4x128xf32, #tpu.memory_space<vmem>>, %arg3: memref<32x32xbf16, #tpu.memory_space<vmem>>, %arg4: memref<32x1xf32, #tpu.memory_space<vmem>>, %arg5: memref<1x32xf32, #tpu.memory_space<vmem>>, %arg6: memref<1x4xf32, #tpu.memory_space<vmem>>, %arg7: memref<1xf32, #tpu.memory_space<smem>>, %arg8: memref<1x128xf32, #tpu.memory_space<vmem>>) attributes {dimension_semantics = [#tpu.dimension_semantics<parallel>], iteration_bounds = array<i64: 1>, scalar_prefetch = 0 : i64, scratch_operands = 0 : i64, tpu.core_type = #tpu.core_type<tc>, window_params = [{transform_indices = @transform_0, window_bounds = array<i64: 32, 128>}, {transform_indices = @transform_1, window_bounds = array<i64: 4, 128>}, {pipeline_mode = #tpu.pipeline_mode<synchronous>, transform_indices = @transform_2, window_bounds = array<i64: 32, 32>}, {pipeline_mode = #tpu.pipeline_mode<synchronous>, transform_indices = @transform_3, window_bounds = array<i64: 32, 1>}, {pipeline_mode = #tpu.pipeline_mode<synchronous>, transform_indices = @transform_4, window_bounds = array<i64: 1, 32>}, {pipeline_mode = #tpu.pipeline_mode<synchronous>, transform_indices = @transform_5, window_bounds = array<i64: 1, 4>}, {transform_indices = @transform_6, window_bounds = array<i64: 1>}, {transform_indices = @transform_7, window_bounds = array<i64: 1, 128>}]} {
    %c0 = arith.constant 0 : index
    %c0_0 = arith.constant 0 : index
    %0 = vector.load %arg3[%c0, %c0_0] : memref<32x32xbf16, #tpu.memory_space<vmem>>, vector<32x32xbf16>
    %c0_1 = arith.constant 0 : index
    %c0_2 = arith.constant 0 : index
    %1 = vector.load %arg1[%c0_1, %c0_2] : memref<32x128xbf16, #tpu.memory_space<vmem>>, vector<32x128xbf16>
    %cst = arith.constant dense<0.000000e+00> : vector<32x128xf32>
    %2 = tpu.matmul %0, %1, %cst {dimension_numbers = #tpu.dot_dimension_numbers<[1], [0], [0], [1], [0, 0, 1, 1], [], []>} : vector<32x32xbf16>, vector<32x128xbf16>, vector<32x128xf32> -> vector<32x128xf32>
    %c0_3 = arith.constant 0 : index
    %c0_4 = arith.constant 0 : index
    %3 = vector.load %arg4[%c0_3, %c0_4] : memref<32x1xf32, #tpu.memory_space<vmem>>, vector<32x1xf32>
    %4 = vector.broadcast %3 : vector<32x1xf32> to vector<32x128xf32>
    %5 = arith.addf %2, %4 : vector<32x128xf32>
    %cst_5 = arith.constant 0.000000e+00 : f32
    %6 = vector.broadcast %cst_5 : f32 to vector<32x128xf32>
    %7 = arith.maximumf %5, %6 : vector<32x128xf32>
    %c0_6 = arith.constant 0 : index
    %c0_7 = arith.constant 0 : index
    %8 = vector.load %arg5[%c0_6, %c0_7] : memref<1x32xf32, #tpu.memory_space<vmem>>, vector<1x32xf32>
    %cst_8 = arith.constant dense<0.000000e+00> : vector<1x128xf32>
    %9 = tpu.matmul %8, %7, %cst_8 {dimension_numbers = #tpu.dot_dimension_numbers<[1], [0], [0], [1], [0, 0, 1, 1], [], []>} : vector<1x32xf32>, vector<32x128xf32>, vector<1x128xf32> -> vector<1x128xf32>
    %c0_9 = arith.constant 0 : index
    %c0_10 = arith.constant 0 : index
    %10 = vector.load %arg6[%c0_9, %c0_10] : memref<1x4xf32, #tpu.memory_space<vmem>>, vector<1x4xf32>
    %c0_11 = arith.constant 0 : index
    %c0_12 = arith.constant 0 : index
    %11 = vector.load %arg2[%c0_11, %c0_12] : memref<4x128xf32, #tpu.memory_space<vmem>>, vector<4x128xf32>
    %cst_13 = arith.constant dense<0.000000e+00> : vector<1x128xf32>
    %12 = tpu.matmul %10, %11, %cst_13 {dimension_numbers = #tpu.dot_dimension_numbers<[1], [0], [0], [1], [0, 0, 1, 1], [], []>} : vector<1x4xf32>, vector<4x128xf32>, vector<1x128xf32> -> vector<1x128xf32>
    %13 = arith.addf %9, %12 : vector<1x128xf32>
    %c0_14 = arith.constant 0 : index
    %14 = memref.load %arg7[%c0_14] : memref<1xf32, #tpu.memory_space<smem>>
    %15 = vector.broadcast %14 : f32 to vector<1x128xf32>
    %16 = arith.addf %13, %15 : vector<1x128xf32>
    %cst_15 = arith.constant 0.000000e+00 : f32
    %17 = vector.broadcast %cst_15 : f32 to vector<1x128xf32>
    %18 = arith.subf %17, %16 : vector<1x128xf32>
    %19 = math.exp %18 : vector<1x128xf32>
    %cst_16 = arith.constant 1.000000e+00 : f32
    %20 = vector.broadcast %cst_16 : f32 to vector<1x128xf32>
    %21 = arith.addf %20, %19 : vector<1x128xf32>
    %22 = tpu.reciprocal %21 {approx = true} : vector<1x128xf32> -> vector<1x128xf32>
    %c0_17 = arith.constant 0 : index
    %c0_18 = arith.constant 0 : index
    %23 = vector.load %arg8[%c0_17, %c0_18] : memref<1x128xf32, #tpu.memory_space<vmem>>, vector<1x128xf32>
    tpu.vector_store %arg8[%c0_17, %c0_18], %22 {strides = array<i32>} : memref<1x128xf32, #tpu.memory_space<vmem>>, vector<1x128xf32>,
    return
  }
  func.func @transform_0(%arg0: i32) -> (i32, i32) {
    %c0_i32 = arith.constant 0 : i32
    %c0_i32_0 = arith.constant 0 : i32
    return %c0_i32, %arg0 : i32, i32
  }
  func.func @transform_1(%arg0: i32) -> (i32, i32) {
    %c0_i32 = arith.constant 0 : i32
    %c0_i32_0 = arith.constant 0 : i32
    return %c0_i32, %arg0 : i32, i32
  }
  func.func @transform_2(%arg0: i32) -> (i32, i32) {
    %c0_i32 = arith.constant 0 : i32
    %c0_i32_0 = arith.constant 0 : i32
    %c0_i32_1 = arith.constant 0 : i32
    return %c0_i32, %c0_i32_0 : i32, i32
  }
  func.func @transform_3(%arg0: i32) -> (i32, i32) {
    %c0_i32 = arith.constant 0 : i32
    %c0_i32_0 = arith.constant 0 : i32
    %c0_i32_1 = arith.constant 0 : i32
    return %c0_i32, %c0_i32_0 : i32, i32
  }
  func.func @transform_4(%arg0: i32) -> (i32, i32) {
    %c0_i32 = arith.constant 0 : i32
    %c0_i32_0 = arith.constant 0 : i32
    %c0_i32_1 = arith.constant 0 : i32
    return %c0_i32, %c0_i32_0 : i32, i32
  }
  func.func @transform_5(%arg0: i32) -> (i32, i32) {
    %c0_i32 = arith.constant 0 : i32
    %c0_i32_0 = arith.constant 0 : i32
    %c0_i32_1 = arith.constant 0 : i32
    return %c0_i32, %c0_i32_0 : i32, i32
  }
  func.func @transform_6(%arg0: i32) -> i32 {
    %c0_i32 = arith.constant 0 : i32
    %c0_i32_0 = arith.constant 0 : i32
    return %c0_i32 : i32
  }
  func.func @transform_7(%arg0: i32) -> (i32, i32) {
    %c0_i32 = arith.constant 0 : i32
    %c0_i32_0 = arith.constant 0 : i32
    return %c0_i32, %arg0 : i32, i32
  }
}

</mosaic_0001>

<bundles_post_ra>
// kernel: tpu_custom_call.1
= control target key start
LH: loop header
LB: loop body
LE: loop exit
PB: predicated region body
PF: predicated region fallthrough
CT: control target
= control target key end

     0   :  { %13 = vsyncpa [#allocation4], 0  ;;  %s380_s0 = inlined_call_operand.vmem [shape: bf16[32,128], index: 0, kind: input, shape index: {}]   ;;  %s381_s1 = inlined_call_operand.hbm [shape: f32[4,128], index: 1, kind: input, shape index: {}]   ;;  %s382_s2 = inlined_call_operand.vmem [shape: bf16[32,32], index: 2, kind: input, shape index: {}]   ;;  %s383_s3 = inlined_call_operand.vmem [shape: f32[32,1], index: 3, kind: input, shape index: {}]   ;;  %s384_s4 = inlined_call_operand.vmem [shape: f32[1,32], index: 4, kind: input, shape index: {}]   ;;  %s385_s5 = inlined_call_operand.vmem [shape: f32[1,4], index: 5, kind: input, shape index: {}]   ;;  %s386_s6 = inlined_call_operand.<no memory space> [shape: f32[1], index: 6, kind: input, shape index: {}]   ;;  %s387_s7 = inlined_call_operand.hbm [shape: f32[1,128], index: 7, kind: output, shape index: {}]  }
   0x1   :  { %14 = vsyncpa [#allocation5], 0  ;;  %s22_s26 = sshll.u32 %s381_s1, 4  ;;  %s295_s27 = smov [#allocation3]   ;;  %s23_s26 = int_to_ptr.hbm [resolvable:$true] %s22_s26 }
   0x2   :  { %s24_s28 = sshll.u32 %s295_s27, 4  ;;  %s25_s28 = int_to_ptr.vmem [resolvable:$true] %s24_s28 }
   0x3   :  { %27 = dma.hbm_to_vmem [thread:$0]  %s23_s26, 64, %s25_s28, [#allocation4]  }
   0x4   :  { %291 = dma.done.wait [#allocation4], 64  }
   0x5   :  { %292 = vsyncadd [#allocation4], 4294967232  ;;  %v296_v0 = vmov 0   ;;  %v231_v1 = vld [vmem:[%s380_s0 + $0x8] sm:$0xff]  ;;  %v54_v2 = vld [vmem:[%s383_s3 + $0x18] sm:$0xff]  ;;  %vm97_vm0 = vcmask 261120   ;;  %v182_v30 = vstv %s386_s6 }
   0x6   :  { %237 = vset.pattern.permute.xlu0 %v296_v0  ;;  %238 = vset.pattern.permute.xlu1 %v296_v0  ;;  %v52_v3 = vld [vmem:[%s383_s3 + $0x8] sm:$0xff]  ;;  %v230_v4 = vld [vmem:[%s380_s0] sm:$0xff]  ;;  %v53_v7 = vld [vmem:[%s383_s3 + $0x10] sm:$0xff]  ;;  %vm134_vm1 = vcmask 1043456   ;;  %vm130_vm2 = vcmask 31744   ;;  %s297_s23 = smov [#allocation6]  }
   0x7   :  { %232 = vmatpush.bf16.msra.mxu3 %v231_v1  ;;  %110 = vmatpush.bf16.msra.mxu0 %v231_v1  ;;  %v229_v5 = vld [vmem:[%s382_s2 + $0x8] sm:$0xff]  ;;  %v228_v6 = vld [vmem:[%s382_s2] sm:$0xff]  ;;  %s195_s24 = sshll.u32 %s297_s23, 4  ;;  %s197_s26 = sshll.u32 %s387_s7, 4  ;;  %s196_s24 = int_to_ptr.vmem [resolvable:$true] %s195_s24  ;;  %s198_s26 = int_to_ptr.hbm [resolvable:$true] %s197_s26 }
   0x8   :  { %72 = vperm.xlu0 %237, %v54_v2   ;;  %62 = vperm.xlu1 %238, %v52_v3   ;;  %v51_v8 = vld [vmem:[%s383_s3] sm:$0xff] }
   0x9   :  { %v129_v9 = vld [vmem:[#allocation3] sm:$0xf] }
   0xa   :  { %v128_v10 = vld [vmem:[%s385_s5] sm:$0x1]  ;;  %225 = vmatpush.msk.msra.mxu1 %vm134_vm1, %v129_v9 }
   0xb   :  { %233 = vmatpush.bf16.msra.mxu3 %v230_v4  ;;  %111 = vmatpush.bf16.msra.mxu0 %v230_v4  ;;  %v127_v27 = vld [vmem:[%s384_s4] sm:$0x1] }
   0xc   :  { %226 = vmatmul.msk.f32.vlgmr.msra.gmra.mxu1 %vm130_vm2, %v128_v10 }
   0xe   :  { %224 = vmatmul.msk.bf16.vlgmr.msra.gmra.mxu3 %vm97_vm0, %v229_v5  ;;  %223 = vmatmul.msk.bf16.vlgmr.msra.gmra.mxu0 %vm97_vm0, %v228_v6 }
  0x10   :  { %67 = vperm.xlu0 %237, %v53_v7   ;;  %57 = vperm.xlu1 %238, %v51_v8  }
  0x7a   :  { %v73_v11 = vpop.permute.xlu0 %72  ;;  %v63_v13 = vpop.permute.xlu1 %62 }
  0x82   :  { %v68_v15 = vpop.permute.xlu0 %67  ;;  %v58_v20 = vpop.permute.xlu1 %57 }
  0x89   :  { %v155_v28 = vpop.f32.mrf.mxu1 }
  0x8b   :  { %v113_v12 = vpop.f32.mrf.mxu0 }
  0x8c   :  { %v114_v24 = vadd.f32 %v113_v12, %v58_v20 }
  0x8e   :  { %v123_v26 = vmax.f32 %v114_v24, 0.0 }
  0x91   :  { %v118_v14 = vpop.f32.mrf.mxu3 }
  0x92   :  { %v119_v18 = vadd.f32 %v118_v14, %v68_v15 }
  0x93   :  { %v115_v16 = vpop.f32.mrf.mxu0 }
  0x94   :  { %v116_v21 = vadd.f32 %v115_v16, %v63_v13  ;;  %v125_v23 = vmax.f32 %v119_v18, 0.0 }
  0x96   :  { %v124_v25 = vmax.f32 %v116_v21, 0.0 }
  0x99   :  { %v120_v17 = vpop.f32.mrf.mxu3 }
  0x9a   :  { %v121_v19 = vadd.f32 %v120_v17, %v73_v11 }
  0x9c   :  { %v126_v22 = vmax.f32 %v121_v19, 0.0 }
  0x9e   :  { %173 = vmatpush.msra.mxu2 %v126_v22 }
  0xa0   :  { %174 = vmatpush.msra.mxu2 %v125_v23 }
  0xa2   :  { %175 = vmatpush.msra.mxu2 %v124_v25 }
  0xa4   :  { %176 = vmatpush.msra.mxu2 %v123_v26 }
  0xa5   :  { %227 = vmatmul.msk.f32.vlgmr.msra.gmra.mxu2 %vm97_vm0, %v127_v27 }
 0x128   :  { %v178_v29 = vpop.f32.mrf.mxu2 }
 0x129   :  { %v179_v31 = vadd.f32 %v178_v29, %v155_v28 }
 0x12b   :  { %v183_v32 = vadd.f32 %v182_v30, %v179_v31 }
 0x12d   :  { %v184_v33 = vsub.f32 0.0, %v183_v32 }
 0x12f   :  { %v185_v34 = vmul.f32 1.442695, %v184_v33 }
 0x131   :  { %239 = vpow2.f32 %v185_v34 }
 0x137   :  { %v240_v35 = vpop.eup %239 }
 0x138   :  { %v187_v36 = vadd.f32 1.0, %v240_v35 }
 0x13a   :  { %241 = vrcp.f32 %v187_v36 }
 0x140   :  { %v242_v37 = vpop.eup %241 }
 0x141   :  { %189 = vst [vmem:[#allocation6] sm:$0x1] %v242_v37 }
 0x142   :  { %200 = dma.vmem_to_hbm [thread:$0]  %s196_s24, 16, %s198_s26, [#allocation5]  }
 0x143   :  { %293 = dma.done.wait [#allocation5], 16  }
 0x144   :  { %294 = vsyncadd [#allocation5], 4294967280 }
 0x145   :  { %205 = vsyncpa [#allocation4], 1 }
 0x146   :  { %206 = vsyncpa [#allocation5], 1 }

</bundles_post_ra>
